<compile_context>
chip_gen: v7x
topology: tpu7x:2x2x1
jax: 0.10.0
libtpu: 0.0.40
codegen_flags: <defaults>
</compile_context>

<pallas_src>
import jax
import jax.numpy as jnp
from jax.experimental import pallas as pl
from jax.experimental.pallas import tpu as pltpu

LANE = 128
SUBLANE = 8
RANK = 4  # static, matches the PyTorch default rank=4


def _round_up(x, m):
    return (x + m - 1) // m * m


# -----------------------------------------------------------------------------
# Kernel 1: GaussianExpansion.forward  (the spec module)
#   out[b, g] = exp(-0.5 / widths[g]^2 * (property[b] - offsets[g])^2)
# -----------------------------------------------------------------------------
def gaussian_expansion_kernel(prop_ref,   # VMEM (TB, 1)
                              off_ref,    # VMEM (1, NGp)   offsets (lane-padded)
                              coeff_ref,  # VMEM (1, NGp)   -0.5 / widths^2 (lane-padded)
                              out_ref):   # VMEM (TB, NGp)
    diff = prop_ref[...] - off_ref[...]
    out_ref[...] = jnp.exp(coeff_ref[...] * diff * diff)


def gaussian_expansion(prop, offsets, widths, *, block_b=512):
    """Pallas GaussianExpansion: prop (B, 1) -> (B, n_gaussians)."""
    B = prop.shape[0]
    ng = offsets.shape[0]
    ng_pad = _round_up(ng, LANE)                       # lane-dense output slab
    tb = min(block_b, _round_up(B, SUBLANE))
    b_pad = _round_up(B, tb)

    coeff = -0.5 / (widths.astype(jnp.float32) ** 2)
    off_p = jnp.pad(offsets.astype(jnp.float32).reshape(1, ng), ((0, 0), (0, ng_pad - ng)))
    coeff_p = jnp.pad(coeff.reshape(1, ng), ((0, 0), (0, ng_pad - ng)), constant_values=-0.5)
    prop_p = jnp.pad(prop.astype(jnp.float32), ((0, b_pad - B), (0, 0)))

    const = lambda i: (0, 0)
    out = pl.pallas_call(
        gaussian_expansion_kernel,
        out_shape=jax.ShapeDtypeStruct((b_pad, ng_pad), jnp.float32),
        grid=(b_pad // tb,),
        in_specs=[pl.BlockSpec((tb, 1), lambda i: (i, 0)),
                  pl.BlockSpec((1, ng_pad), const),
                  pl.BlockSpec((1, ng_pad), const)],
        out_specs=pl.BlockSpec((tb, ng_pad), lambda i: (i, 0)),
        compiler_params=pltpu.CompilerParams(dimension_semantics=("parallel",)),
    )(prop_p, off_p, coeff_p)
    return out[:B, :ng]


# -----------------------------------------------------------------------------
# Kernel 2: fused condition embedding (condition_prop path) — GaussianExpansion
# recomputed in-kernel so the whole layer is a single pallas_call.
#   out = sum_r fw[r] * ([1,z] @ z_factor[r]) * ([1,GE(fe)] @ emb_factor[r]) + bias
# -----------------------------------------------------------------------------
def lmf_kernel(zh_ref,     # VMEM (TB, z_dim+1)       z with ones column prepended
               fe_ref,     # VMEM (TB, 1)             scalar property
               off_ref,    # VMEM (1, n_basis)        gaussian offsets
               coeff_ref,  # VMEM (1, n_basis)        -0.5 / width^2
               zf_ref,     # VMEM (z_dim+1, R*out)    rank-fused z factor
               efw_ref,    # VMEM (n_basis, R*out)    rank-fused emb factor (pre-scaled by fw)
               efb_ref,    # VMEM (1, R*out)          emb-factor bias row (pre-scaled by fw)
               red_ref,    # VMEM (R*out, out_pad)    block-identity rank-reduction matrix
               fb_ref,     # VMEM (1, out_pad)        fusion bias (lane-padded)
               out_ref):   # VMEM (TB, out_pad)
    # GaussianExpansion fused in (f32 exp on the EUP)
    diff = fe_ref[...] - off_ref[...]
    cond = jnp.exp(coeff_ref[...] * diff * diff)                       # (TB, n_basis)

    # one lane-dense 128-wide matmul per modality
    fz = jnp.dot(zh_ref[...], zf_ref[...], preferred_element_type=jnp.float32)
    fc = efb_ref[...] + jnp.dot(cond, efw_ref[...], preferred_element_type=jnp.float32)

    # rank reduction stays on the MXU; output slab is lane-dense (out_pad = k*128)
    prod = fz * fc
    out_ref[...] = jnp.dot(prod, red_ref[...],
                           preferred_element_type=jnp.float32) + fb_ref[...]


def lmf_condition_embedding(z, fe_c, params, *, block_b=512):
    B, z_dim = z.shape
    z_factor = params["z_factor"]        # (rank, z_dim+1, out)
    emb_factor = params["emb_factor"]    # (rank, n_basis+1, out)
    fw = params["fusion_weights"]        # (1, rank)
    rank, _, out_dim = z_factor.shape
    n_basis = params["offsets"].shape[0]

    # --- wrapper-side layout work: fold fusion_weights, fuse rank into N dimension ---
    ef_scaled = emb_factor * fw[0, :, None, None]
    zf_fused = jnp.transpose(z_factor, (1, 0, 2)).reshape(z_dim + 1, rank * out_dim)
    efw_fused = jnp.transpose(ef_scaled[:, 1:, :], (1, 0, 2)).reshape(n_basis, rank * out_dim)
    efb_fused = ef_scaled[:, 0, :].reshape(1, rank * out_dim)

    out_pad = _round_up(out_dim, LANE)
    # out[b, o] = sum_r prod[b, r*out + o]  ->  stacked-identity reduction matrix
    red = jnp.tile(jnp.eye(out_dim, dtype=jnp.float32), (rank, 1))      # (rank*out, out)
    red = jnp.pad(red, ((0, 0), (0, out_pad - out_dim)))
    fb = jnp.pad(params["fusion_bias"].astype(jnp.float32), ((0, 0), (0, out_pad - out_dim)))

    coeff = (-0.5 / (params["widths"].astype(jnp.float32) ** 2)).reshape(1, n_basis)
    off = params["offsets"].astype(jnp.float32).reshape(1, n_basis)

    # batch tiling: TB multiple of 8 (512 when batch is large), batch axis "parallel"
    tb = min(block_b, _round_up(B, SUBLANE))
    b_pad = _round_up(B, tb)
    zh = jnp.concatenate([jnp.ones((B, 1), jnp.float32), z.astype(jnp.float32)], axis=1)
    zh = jnp.pad(zh, ((0, b_pad - B), (0, 0)))                          # ones column folded in
    fe = jnp.pad(fe_c.astype(jnp.float32), ((0, b_pad - B), (0, 0)))

    const = lambda i: (0, 0)
    out = pl.pallas_call(
        lmf_kernel,
        out_shape=jax.ShapeDtypeStruct((b_pad, out_pad), jnp.float32),
        grid=(b_pad // tb,),
        in_specs=[pl.BlockSpec((tb, z_dim + 1), lambda i: (i, 0)),
                  pl.BlockSpec((tb, 1), lambda i: (i, 0)),
                  pl.BlockSpec((1, n_basis), const),
                  pl.BlockSpec((1, n_basis), const),
                  pl.BlockSpec((z_dim + 1, rank * out_dim), const),
                  pl.BlockSpec((n_basis, rank * out_dim), const),
                  pl.BlockSpec((1, rank * out_dim), const),
                  pl.BlockSpec((rank * out_dim, out_pad), const),
                  pl.BlockSpec((1, out_pad), const)],
        out_specs=pl.BlockSpec((tb, out_pad), lambda i: (i, 0)),
        compiler_params=pltpu.CompilerParams(dimension_semantics=("parallel",)),
    )(zh, fe, off, coeff, zf_fused, efw_fused, efb_fused, red, fb)
    return out[:B, :out_dim]


# -----------------------------------------------------------------------------
# Pure-JAX references mirroring the PyTorch forward passes
# -----------------------------------------------------------------------------
def gaussian_expansion_ref(prop, offsets, widths):
    coeff = -0.5 / (widths[None, :] ** 2)
    diff = prop - offsets[None, :]
    return jnp.exp(coeff * diff * diff)


def lmf_ref(z, fe_c, params):
    cond = gaussian_expansion_ref(fe_c, params["offsets"], params["widths"])
    ones = jnp.ones((z.shape[0], 1), jnp.float32)
    z_h = jnp.concatenate([ones, z], axis=1)
    c_h = jnp.concatenate([ones, cond], axis=1)
    fz = jnp.einsum("bi,rio->rbo", z_h, params["z_factor"])
    fc = jnp.einsum("bi,rio->rbo", c_h, params["emb_factor"])
    out = jnp.einsum("r,rbo->bo", params["fusion_weights"][0], fz * fc)
    return out + params["fusion_bias"]


def make_params(key, z_dim, n_basis, out_dim, rank, start=-2.0, stop=2.0):
    k1, k2, k3 = jax.random.split(key, 3)

    def xavier_normal(k, shape):
        rf = 1
        for s in shape[2:]:
            rf *= s
        fan_in = shape[1] * rf
        fan_out = shape[0] * rf
        std = (2.0 / (fan_in + fan_out)) ** 0.5
        return std * jax.random.normal(k, shape, jnp.float32)

    offsets = jnp.linspace(start, stop, n_basis, dtype=jnp.float32)
    widths = (offsets[1] - offsets[0]) * jnp.ones_like(offsets)
    return {
        "offsets": offsets,
        "widths": widths,
        "z_factor": xavier_normal(k1, (rank, z_dim + 1, out_dim)),
        "emb_factor": xavier_normal(k2, (rank, n_basis + 1, out_dim)),
        "fusion_weights": xavier_normal(k3, (1, rank)),
        "fusion_bias": jnp.zeros((1, out_dim), jnp.float32),
    }


# TODO(synk): the condition_formula path (comp_embedding) needs AtomEmbedding + scatter-mean,
# which are not defined in the reference source; only the scalar-property path is implemented.

if __name__ == "__main__":
    B, Z_DIM, N_BASIS, OUT_DIM = 8, 32, 50, 32

    key = jax.random.PRNGKey(0)
    kz, kf, kp = jax.random.split(key, 3)
    z = jax.random.normal(kz, (B, Z_DIM), jnp.float32)
    fe_c = jax.random.normal(kf, (B, 1), jnp.float32)
    params = make_params(kp, Z_DIM, N_BASIS, OUT_DIM, RANK)

    # 1) The spec module: GaussianExpansion.forward
    ge = jax.block_until_ready(gaussian_expansion(fe_c, params["offsets"], params["widths"]))
    ge_ref = gaussian_expansion_ref(fe_c, params["offsets"], params["widths"])
    assert ge.shape == (B, N_BASIS)
    assert jnp.allclose(ge, ge_ref, atol=1e-5, rtol=1e-5), "GaussianExpansion mismatch"

    # 2) The fused condition-embedding path that consumes the expansion
    out = jax.block_until_ready(lmf_condition_embedding(z, fe_c, params))
    ref = lmf_ref(z, fe_c, params)
    assert out.shape == (B, OUT_DIM)
    assert jnp.allclose(out, ref, atol=1e-4, rtol=1e-4), "fused condition embedding mismatch"

    print("KERNEL_OK")
</pallas_src>

<mosaic_0001>
module attributes {stable_mosaic.version = 11 : i64} {
  func.func @gaussian_expansion_kernel(%arg0: i32, %arg1: memref<8x1xf32, #tpu.memory_space<vmem>>, %arg2: memref<1x128xf32, #tpu.memory_space<vmem>>, %arg3: memref<1x128xf32, #tpu.memory_space<vmem>>, %arg4: memref<8x128xf32, #tpu.memory_space<vmem>>) attributes {dimension_semantics = [#tpu.dimension_semantics<parallel>], iteration_bounds = array<i64: 1>, scalar_prefetch = 0 : i64, scratch_operands = 0 : i64, tpu.core_type = #tpu.core_type<tc>, window_params = [{transform_indices = @transform_0, window_bounds = array<i64: 8, 1>}, {pipeline_mode = #tpu.pipeline_mode<synchronous>, transform_indices = @transform_1, window_bounds = array<i64: 1, 128>}, {pipeline_mode = #tpu.pipeline_mode<synchronous>, transform_indices = @transform_2, window_bounds = array<i64: 1, 128>}, {transform_indices = @transform_3, window_bounds = array<i64: 8, 128>}]} {
    %c0 = arith.constant 0 : index
    %c0_0 = arith.constant 0 : index
    %0 = vector.load %arg1[%c0, %c0_0] : memref<8x1xf32, #tpu.memory_space<vmem>>, vector<8x1xf32>
    %c0_1 = arith.constant 0 : index
    %c0_2 = arith.constant 0 : index
    %1 = vector.load %arg2[%c0_1, %c0_2] : memref<1x128xf32, #tpu.memory_space<vmem>>, vector<1x128xf32>
    %2 = vector.broadcast %0 : vector<8x1xf32> to vector<8x128xf32>
    %3 = vector.broadcast %1 : vector<1x128xf32> to vector<8x128xf32>
    %4 = arith.subf %2, %3 : vector<8x128xf32>
    %c0_3 = arith.constant 0 : index
    %c0_4 = arith.constant 0 : index
    %5 = vector.load %arg3[%c0_3, %c0_4] : memref<1x128xf32, #tpu.memory_space<vmem>>, vector<1x128xf32>
    %6 = vector.broadcast %5 : vector<1x128xf32> to vector<8x128xf32>
    %7 = arith.mulf %6, %4 : vector<8x128xf32>
    %8 = arith.mulf %7, %4 : vector<8x128xf32>
    %9 = math.exp %8 : vector<8x128xf32>
    %c0_5 = arith.constant 0 : index
    %c0_6 = arith.constant 0 : index
    %10 = vector.load %arg4[%c0_5, %c0_6] : memref<8x128xf32, #tpu.memory_space<vmem>>, vector<8x128xf32>
    tpu.vector_store %arg4[%c0_5, %c0_6], %9 {strides = array<i32>} : memref<8x128xf32, #tpu.memory_space<vmem>>, vector<8x128xf32>,
    return
  }
  func.func @transform_0(%arg0: i32) -> (i32, i32) {
    %c0_i32 = arith.constant 0 : i32
    %c0_i32_0 = arith.constant 0 : i32
    return %arg0, %c0_i32 : i32, i32
  }
  func.func @transform_1(%arg0: i32) -> (i32, i32) {
    %c0_i32 = arith.constant 0 : i32
    %c0_i32_0 = arith.constant 0 : i32
    %c0_i32_1 = arith.constant 0 : i32
    return %c0_i32, %c0_i32_0 : i32, i32
  }
  func.func @transform_2(%arg0: i32) -> (i32, i32) {
    %c0_i32 = arith.constant 0 : i32
    %c0_i32_0 = arith.constant 0 : i32
    %c0_i32_1 = arith.constant 0 : i32
    return %c0_i32, %c0_i32_0 : i32, i32
  }
  func.func @transform_3(%arg0: i32) -> (i32, i32) {
    %c0_i32 = arith.constant 0 : i32
    %c0_i32_0 = arith.constant 0 : i32
    return %arg0, %c0_i32 : i32, i32
  }
}

</mosaic_0001>

<bundles_post_ra>
// kernel: tpu_custom_call.1
= control target key start
LH: loop header
LB: loop body
LE: loop exit
PB: predicated region body
PF: predicated region fallthrough
CT: control target
= control target key end

     0   :  { %v86_v1 = vmov 0   ;;  %s129_s0 = inlined_call_operand.vmem [shape: f32[8,1], index: 0, kind: input, shape index: {}]   ;;  %s130_s1 = inlined_call_operand.vmem [shape: f32[1,128], index: 1, kind: input, shape index: {}]   ;;  %s131_s2 = inlined_call_operand.vmem [shape: f32[1,128], index: 2, kind: input, shape index: {}]   ;;  %s132_s3 = inlined_call_operand.hbm [shape: f32[8,128], index: 3, kind: output, shape index: {}]  }
   0x1   :  { %v15_v0 = vld [vmem:[%s129_s0] sm:$0xff]  ;;  %59 = vset.pattern.permute.xlu0 %v86_v1 }
   0x2   :  { %8 = vsyncpa [#allocation3], 0  ;;  %19 = vperm.xlu0 %59, %v15_v0   ;;  %v55_v2 = vld [vmem:[%s130_s1] ss:$0 sm:$0xff]  ;;  %s87_s18 = smov [#allocation2]  }
   0x3   :  { %v56_v3 = vld [vmem:[%s131_s2] ss:$0 sm:$0xff]  ;;  %s47_s0 = sshll.u32 %s87_s18, 4  ;;  %s48_s0 = int_to_ptr.vmem [resolvable:$true] %s47_s0 }
   0x4   :  { %s62_s19 = scalar_lea.vmem %s48_s0, 128  ;;  %p67_p1 = scmp.lt.s32.totalorder %s48_s0, %s48_s0 }
   0x5   :  { %p63_p0 = scmp.ne.s32.totalorder %s48_s0, %s62_s19  ;;  %p68_p2 = scmp.lt.s32.totalorder %s62_s19, %s62_s19 }
   0x7   :  { %p69_p3 = por %p68_p2, %p67_p1 }
   0x9   :  { %p70_p4 = pnand %p69_p3, %p63_p0 }
  0x81   :  { %v20_v4 = vpop.permute.xlu0 %19 }
  0x82   :  { %v28_v5 = vsub.f32 %v20_v4, %v55_v2 }
  0x84   :  { %v36_v6 = vmul.f32 %v56_v3, %v28_v5 }
  0x86   :  { %v37_v7 = vmul.f32 %v36_v6, %v28_v5 }
  0x88   :  { %v38_v8 = vmul.f32 1.442695, %v37_v7 }
  0x8a   :  { %60 = vpow2.f32 %v38_v8 }
  0x94   :  { %v61_v9 = vpop.eup %60 }
  0x95   :  { %40 = vst [vmem:[#allocation2] sm:$0xff] %v61_v9 }
  0x96   :  { %73 = shalt.err (!%p70_p4)
}
  0x97   :  { %s74_s20 = scalar_lea.hbm %s132_s3, 128 }
  0x98   :  { %p75_p5 = scmp.ne.s32.totalorder %s132_s3, %s74_s20  ;;  %p78_p6 = scmp.lt.u32.totalorder %s74_s20, %s132_s3 }
  0x9a   :  { %p80_p7 = pnand %p78_p6, %p75_p5 }
  0x9c   :  { %83 = shalt.err (!%p80_p7)
}
  0x9d   :  { %50 = dma.vmem_to_hbm [thread:$0]  %s48_s0, 128, %s132_s3, [#allocation3]  }
  0x9e   :  { %84 = dma.done.wait [#allocation3], 128  }
  0x9f   :  { %85 = vsyncadd [#allocation3], 4294967168 }
  0xa0   :  { %54 = vsyncpa [#allocation3], 1 }

</bundles_post_ra>
